<compile_context>
chip_gen: v7x
topology: tpu7x:2x2x1
jax: 0.10.0
libtpu: 0.0.40
codegen_flags: <defaults>
</compile_context>

<pallas_src>
import jax
import jax.numpy as jnp
from jax.experimental import pallas as pl
from jax.experimental.pallas import tpu as pltpu


# -----------------------------------------------------------------------------
# Kernels (all operate on (C, N) blocks: channels on sublanes, points on lanes)
# -----------------------------------------------------------------------------
def _l2norm_kernel(x_ref, o_ref):
    # torch.norm(features, p=2, dim=1) + div : per-point (per-column) L2 norm
    # over the channel (sublane) axis.
    x = x_ref[...]                                                # (C, N)
    ss = jnp.sum(x * x, axis=0, keepdims=True)                    # (1, N)
    inv = jax.lax.rsqrt(jnp.maximum(ss, 1e-24))                   # EUP, eps-guarded
    o_ref[...] = x * inv


def _global_head_kernel(x_ref, w1_ref, b1_ref, w2_ref, b2_ref,
                        w3_ref, b3_ref, o_ref):
    # global_netD1 (two folded conv1x1+BN+ReLU) -> mean over points
    # -> global_netD2 (Linear 128->2).  Full-N block: no accumulator needed.
    n = x_ref.shape[-1]
    x = x_ref[...].astype(jnp.bfloat16)                           # (256, N)
    h1 = jnp.maximum(
        jnp.dot(w1_ref[...], x, preferred_element_type=jnp.float32)
        + b1_ref[...], 0.0)                                       # (256, N) f32
    h2 = jnp.maximum(
        jnp.dot(w2_ref[...], h1.astype(jnp.bfloat16),
                preferred_element_type=jnp.float32)
        + b2_ref[...], 0.0)                                       # (128, N) f32
    mean = jnp.sum(h2, axis=1, keepdims=True) * (1.0 / n)         # (128, 1)
    o_ref[...] = (jnp.dot(w3_ref[...], mean,
                          preferred_element_type=jnp.float32)
                  + b3_ref[...])                                  # (2, 1)


def _local_head_kernel(x_ref, w1_ref, b1_ref, w2_ref, b2_ref,
                       w3_ref, b3_ref, o_ref):
    # local_netD: conv1x1+BN+ReLU, conv1x1+BN+ReLU, conv1x1(128->1), sigmoid.
    x = x_ref[...].astype(jnp.bfloat16)                           # (128, N)
    h1 = jnp.maximum(
        jnp.dot(w1_ref[...], x, preferred_element_type=jnp.float32)
        + b1_ref[...], 0.0)                                       # (128, N)
    h2 = jnp.maximum(
        jnp.dot(w2_ref[...], h1.astype(jnp.bfloat16),
                preferred_element_type=jnp.float32)
        + b2_ref[...], 0.0)                                       # (128, N)
    # 128->1 projection as VPU multiply + sublane reduce; result is a
    # lane-dense (1, N) row -> unmasked stores, output already in (B,1,N).
    logit = jnp.sum(h2 * w3_ref[...], axis=0, keepdims=True) + b3_ref[...]
    o_ref[...] = jax.nn.sigmoid(logit)                            # (1, N)


# -----------------------------------------------------------------------------
# Wrappers (pallas_call glue) — all in NCW layout, full-N blocks, grid=(B,)
# -----------------------------------------------------------------------------
def l2_normalize_features(x_bcn):
    B, C, N = x_bcn.shape
    return pl.pallas_call(
        _l2norm_kernel,
        out_shape=jax.ShapeDtypeStruct((B, C, N), x_bcn.dtype),
        grid_spec=pltpu.PrefetchScalarGridSpec(
            num_scalar_prefetch=0,
            grid=(B,),
            in_specs=[pl.BlockSpec((None, C, N), lambda b: (b, 0, 0))],
            out_specs=pl.BlockSpec((None, C, N), lambda b: (b, 0, 0)),
        ),
        compiler_params=pltpu.CompilerParams(
            dimension_semantics=("parallel",)),
    )(x_bcn)


def global_head(seed_bcn, p):
    B, C, N = seed_bcn.shape
    assert C == 256
    out = pl.pallas_call(
        _global_head_kernel,
        out_shape=jax.ShapeDtypeStruct((B, 2, 1), jnp.float32),
        grid_spec=pltpu.PrefetchScalarGridSpec(
            num_scalar_prefetch=0,
            grid=(B,),
            in_specs=[
                pl.BlockSpec((None, 256, N), lambda b: (b, 0, 0)),
                pl.BlockSpec((256, 256), lambda b: (0, 0)),   # g_w1 (bf16)
                pl.BlockSpec((256, 1), lambda b: (0, 0)),     # g_b1
                pl.BlockSpec((128, 256), lambda b: (0, 0)),   # g_w2 (bf16)
                pl.BlockSpec((128, 1), lambda b: (0, 0)),     # g_b2
                pl.BlockSpec((2, 128), lambda b: (0, 0)),     # g_w3 (f32)
                pl.BlockSpec((2, 1), lambda b: (0, 0)),       # g_b3
            ],
            out_specs=pl.BlockSpec((None, 2, 1), lambda b: (b, 0, 0)),
        ),
        compiler_params=pltpu.CompilerParams(
            dimension_semantics=("parallel",)),
    )(seed_bcn, p["g_w1"], p["g_b1"], p["g_w2"], p["g_b2"],
      p["g_w3"], p["g_b3"])
    return out[:, :, 0]                                           # (B, 2)


def local_head(agg_bcn, p):
    B, C, N = agg_bcn.shape
    assert C == 128
    return pl.pallas_call(
        _local_head_kernel,
        out_shape=jax.ShapeDtypeStruct((B, 1, N), jnp.float32),
        grid_spec=pltpu.PrefetchScalarGridSpec(
            num_scalar_prefetch=0,
            grid=(B,),
            in_specs=[
                pl.BlockSpec((None, 128, N), lambda b: (b, 0, 0)),
                pl.BlockSpec((128, 128), lambda b: (0, 0)),   # l_w1 (bf16)
                pl.BlockSpec((128, 1), lambda b: (0, 0)),     # l_b1
                pl.BlockSpec((128, 128), lambda b: (0, 0)),   # l_w2 (bf16)
                pl.BlockSpec((128, 1), lambda b: (0, 0)),     # l_b2
                pl.BlockSpec((128, 1), lambda b: (0, 0)),     # l_w3 (f32)
                pl.BlockSpec((1, 1), lambda b: (0, 0)),       # l_b3
            ],
            out_specs=pl.BlockSpec((None, 1, N), lambda b: (b, 0, 0)),
        ),
        compiler_params=pltpu.CompilerParams(
            dimension_semantics=("parallel",)),
    )(agg_bcn, p["l_w1"], p["l_b1"], p["l_w2"], p["l_b2"],
      p["l_w3"], p["l_b3"])                                       # (B, 1, N)


# -----------------------------------------------------------------------------
# Parameter construction (deterministic, BN folded into conv weights)
# -----------------------------------------------------------------------------
def _fold_conv_bn(w_oc_ic, b, eps=1e-5, dtype=jnp.bfloat16):
    # BN inference stats: mean=0, var=1, gamma=1, beta=0 (synthetic init;
    # real checkpoints would fold their actual running stats here).
    c_out = w_oc_ic.shape[0]
    gamma = jnp.ones((c_out,), jnp.float32)
    beta = jnp.zeros((c_out,), jnp.float32)
    mean = jnp.zeros((c_out,), jnp.float32)
    var = jnp.ones((c_out,), jnp.float32)
    s = gamma / jnp.sqrt(var + eps)
    w_f = (w_oc_ic * s[:, None]).astype(dtype)                    # (C_out, C_in)
    b_f = ((b - mean) * s + beta).reshape(-1, 1).astype(jnp.float32)
    return w_f, b_f


def init_params(key):
    ks = jax.random.split(key, 12)

    def nrm(k, shape):
        return 0.02 * jax.random.normal(k, shape, jnp.float32)

    p = {}
    # global_netD1: Conv1d(256,256,1)+BN+ReLU, Conv1d(256,128,1)+BN+ReLU
    p["g_w1"], p["g_b1"] = _fold_conv_bn(nrm(ks[0], (256, 256)),
                                         nrm(ks[1], (256,)))
    p["g_w2"], p["g_b2"] = _fold_conv_bn(nrm(ks[2], (128, 256)),
                                         nrm(ks[3], (128,)))
    # global_netD2: Linear(128, 2) — tiny, kept f32
    p["g_w3"] = nrm(ks[4], (2, 128))                              # (2, 128)
    p["g_b3"] = nrm(ks[5], (2,)).reshape(2, 1)
    # local_netD: Conv1d(128,128,1)+BN+ReLU x2, Conv1d(128,1,1)
    p["l_w1"], p["l_b1"] = _fold_conv_bn(nrm(ks[6], (128, 128)),
                                         nrm(ks[7], (128,)))
    p["l_w2"], p["l_b2"] = _fold_conv_bn(nrm(ks[8], (128, 128)),
                                         nrm(ks[9], (128,)))
    p["l_w3"] = nrm(ks[10], (1, 128)).T                           # (128, 1) f32
    p["l_b3"] = nrm(ks[11], (1,)).reshape(1, 1)
    return p


# -----------------------------------------------------------------------------
# Forward (the part of VoteNet_DA_jitter2.forward defined in this module)
# -----------------------------------------------------------------------------
def votenet_da_heads_forward(seed_features, vote_features_raw,
                             aggregated_vote_features, params):
    """All inputs stay in PyTorch NCW layout:
       seed_features:            (B, 256, N_seed)   -- backbone fp2_features
       vote_features_raw:        (B, 256, N_vote)   -- VotingModule output
       aggregated_vote_features: (B, 128, N_prop)   -- ProposalModule features
    """
    end_points = {}
    # vote feature L2 normalization over channel dim
    end_points["vote_features"] = l2_normalize_features(vote_features_raw)
    # grad_reverse == identity in the forward pass
    end_points["global_d_pred"] = global_head(seed_features, params)  # (B, 2)
    end_points["local_d_pred"] = local_head(aggregated_vote_features,
                                            params)                  # (B,1,Np)
    return end_points


if __name__ == "__main__":
    key = jax.random.PRNGKey(0)
    B, N_SEED, N_VOTE, N_PROP = 2, 128, 128, 64

    k1, k2, k3 = jax.random.split(key, 3)
    seed_features = jax.random.normal(k1, (B, 256, N_SEED), jnp.float32)
    vote_features_raw = jax.random.normal(k2, (B, 256, N_VOTE), jnp.float32)
    aggregated_vote_features = jax.random.normal(k3, (B, 128, N_PROP),
                                                 jnp.float32)

    params = init_params(jax.random.PRNGKey(42))

    end_points = votenet_da_heads_forward(
        seed_features, vote_features_raw, aggregated_vote_features, params)
    jax.block_until_ready(end_points)

    assert end_points["global_d_pred"].shape == (B, 2)
    assert end_points["local_d_pred"].shape == (B, 1, N_PROP)
    assert end_points["vote_features"].shape == (B, 256, N_VOTE)
    print("KERNEL_OK")
</pallas_src>

<mosaic_0001>
module attributes {stable_mosaic.version = 11 : i64} {
  func.func @_l2norm_kernel(%arg0: i32, %arg1: memref<1x256x128xf32, #tpu.memory_space<vmem>>, %arg2: memref<1x256x128xf32, #tpu.memory_space<vmem>>) attributes {dimension_semantics = [#tpu.dimension_semantics<parallel>], iteration_bounds = array<i64: 2>, scalar_prefetch = 0 : i64, scratch_operands = 0 : i64, tpu.core_type = #tpu.core_type<tc>, window_params = [{transform_indices = @transform_0, window_bounds = array<i64: 1, 256, 128>}, {transform_indices = @transform_1, window_bounds = array<i64: 1, 256, 128>}]} {
    %c0 = arith.constant 0 : index
    %c0_0 = arith.constant 0 : index
    %c0_1 = arith.constant 0 : index
    %0 = vector.load %arg1[%c0, %c0_0, %c0_1] : memref<1x256x128xf32, #tpu.memory_space<vmem>>, vector<1x256x128xf32>
    %1 = vector.shape_cast %0 : vector<1x256x128xf32> to vector<256x128xf32>
    %2 = arith.mulf %1, %1 : vector<256x128xf32>
    %cst = arith.constant dense<0.000000e+00> : vector<128xf32>
    %3 = vector.multi_reduction <add>, %2, %cst [0] : vector<256x128xf32> to vector<128xf32>
    %4 = vector.shape_cast %3 : vector<128xf32> to vector<1x128xf32>
    %cst_2 = arith.constant 1.000000e-24 : f32
    %5 = vector.broadcast %cst_2 : f32 to vector<1x128xf32>
    %6 = arith.maximumf %4, %5 : vector<1x128xf32>
    %7 = math.rsqrt %6 : vector<1x128xf32>
    %8 = vector.broadcast %7 : vector<1x128xf32> to vector<256x128xf32>
    %9 = arith.mulf %1, %8 : vector<256x128xf32>
    %c0_3 = arith.constant 0 : index
    %c0_4 = arith.constant 0 : index
    %c0_5 = arith.constant 0 : index
    %10 = vector.load %arg2[%c0_3, %c0_4, %c0_5] : memref<1x256x128xf32, #tpu.memory_space<vmem>>, vector<1x256x128xf32>
    %11 = vector.shape_cast %10 : vector<1x256x128xf32> to vector<256x128xf32>
    %12 = vector.shape_cast %9 : vector<256x128xf32> to vector<1x256x128xf32>
    tpu.vector_store %arg2[%c0_3, %c0_4, %c0_5], %12 {strides = array<i32>} : memref<1x256x128xf32, #tpu.memory_space<vmem>>, vector<1x256x128xf32>,
    return
  }
  func.func @transform_0(%arg0: i32) -> (i32, i32, i32) {
    %c0_i32 = arith.constant 0 : i32
    %c0_i32_0 = arith.constant 0 : i32
    %c0_i32_1 = arith.constant 0 : i32
    return %arg0, %c0_i32, %c0_i32_0 : i32, i32, i32
  }
  func.func @transform_1(%arg0: i32) -> (i32, i32, i32) {
    %c0_i32 = arith.constant 0 : i32
    %c0_i32_0 = arith.constant 0 : i32
    %c0_i32_1 = arith.constant 0 : i32
    return %arg0, %c0_i32, %c0_i32_0 : i32, i32, i32
  }
}

</mosaic_0001>

<bundles_post_ra>
// kernel: tpu_custom_call.1
= control target key start
LH: loop header
LB: loop body
LE: loop exit
PB: predicated region body
PF: predicated region fallthrough
CT: control target
= control target key end

     0   :  { %6 = vsyncpa [#allocation3], 0  ;;  %s966_s0 = inlined_call_operand.hbm [shape: f32[2,256,128], index: 0, kind: input, shape index: {}]   ;;  %s967_s1 = inlined_call_operand.hbm [shape: f32[2,256,128], index: 1, kind: output, shape index: {}]  }
   0x1   :  { %8 = vsyncpa [#allocation3 + $0x1], 0 }
   0x2   :  { %9 = vsyncpa [#allocation4], 0 }
   0x3   :  { %11 = vsyncpa [#allocation4 + $0x1], 0  ;;  %s571_s6 = smov 0   ;;  %s573_s7 = smov 0  }
   0x4   :  { %s575_s8 = smov 0   ;;  %s577_s9 = smov 0  }
   0x5 LB: > { %s592_s10 = sadd.s32 4294967295, %s553_s9   ;;  %s389_s11 = sadd.s32 4294967294, %s553_s9   ;;  %s553_s9 = sphi %s577_s9, %s980_s9   ;;  %s549_s8 = sphi %s575_s8, %s979_s8   ;;  %s545_s7 = sphi %s573_s7, %s978_s7   ;;  %s541_s6 = sphi %s571_s6, %s977_s6  }
   0x6   : > { %s596_s12 = sadd.s32 1, %s553_s9   ;;  %s24_s13 = sadd.s32 1, %s549_s8 }
   0x7   : > { %s21_s14 = ssub.s32 %s553_s9, %s596_s12  ;;  %p31_p0 = scmp.ne.s32.totalorder %s549_s8, %s545_s7 }
   0x8   : > { %p22_p1 = scmp.eq.s32.totalorder %s21_s14, 0  ;;  %p32_p2 = scmp.eq.s32.totalorder %s553_s9, 0 }
   0x9   : > { %p37_p3 = scmp.ne.s32.totalorder %s545_s7, %s541_s6  ;;  %p38_p4 = scmp.eq.s32.totalorder %s592_s10, 0 }
   0xa   : > { %s608_s15 = scalar_select %p22_p1, %s549_s8, %s24_s13  }
   0xb   : > { %p610_p5 = por %p32_p2, %p31_p0  ;;  %p614_p6 = por %p38_p4, %p37_p3 }
   0xc   : > { %p61_p7 = scmp.eq.s32.totalorder %s592_s10, 1  ;;  %p67_p8 = scmp.eq.s32.totalorder %s389_s11, 1 }
   0xd   : > { %p417_p10 = scmp.lt.s32.totalorder %s553_s9, 2  ;;  %s87_s20 = sand.u32 1, %s549_s8  }
   0xe   : > { %p621_p11 = por %p61_p7, %p31_p0  ;;  %p625_p12 = por %p67_p8, %p37_p3 }
   0xf   : > { %s403_s21 = sshll.u32 %s553_s9, 12  ;;  %s392_s22 = sshll.u32 %s87_s20, 8 }
  0x10   : > { %s971_s18 = scalar_select %p621_p11, 1, 0 }
  0x11   : > { %s972_s19 = scalar_select %p625_p12, 1, 0 }
  0x12   : > { %s634_s25 = scalar_lea.hbm %s966_s0, %s403_s21  ;;  %s91_s26 = scalar_lea.vmem [#allocation2], %s392_s22 }
  0x13   : > { %s98_s27 = sshll.u32 %s91_s26, 4  ;;  %p638_p13 = pnand %p417_p10, %p610_p5  ;;  %s642_s27 = int_to_ptr.vmem [resolvable:$true] %s98_s27 }
  0x14   : > { %s644_s29 = scalar_lea.sflag [#allocation3], %s87_s20  ;;  %s457_s30 = scalar_lea.hbm %s634_s25, 4096 }
  0x15   : > { %p458_p0 = scmp.ne.s32.totalorder %s634_s25, %s457_s30  ;;  %p459_p1 = pneg %p638_p13 }
  0x16   : > { %s462_s4 = scalar_lea.hbm %s966_s0, 8192  ;;  %p463_p4 = scmp.lt.u32.totalorder %s634_s25, %s966_s0 }
  0x17   : > { %p460_p2 = pnand %p459_p1, %p458_p0  ;;  %p464_p5 = scmp.lt.u32.totalorder %s462_s4, %s457_s30 }
  0x18   : > { %p466_p8 = scmp.lt.u32.totalorder %s457_s30, %s634_s25 }
  0x19   : > { %p461_p3 = pneg %p460_p2  ;;  %p465_p7 = por %p464_p5, %p463_p4 }
  0x1b   : > { %p467_p10 = por %p466_p8, %p465_p7 }
  0x1d   : > { %p468_p9 = pnand %p467_p10, %p461_p3 }
  0x1f   : > { %471 = shalt.err (!%p468_p9)
}
  0x20   : > { %s472_s13 = scalar_lea.vmem %s642_s27, 4096  ;;  %s555_s14 = smov [#allocation2]  }
  0x21   : > { %p473_p0 = scmp.ne.s32.totalorder %s642_s27, %s472_s13  ;;  %s477_s16 = sshll.u32 %s555_s14, 4  ;;  %s478_s16 = int_to_ptr.vmem [resolvable:$false] %s477_s16 }
  0x22   : > { %s479_s20 = scalar_lea.vmem %s478_s16, 8192  ;;  %p480_p11 = scmp.lt.s32.totalorder %s642_s27, %s478_s16 }
  0x23   : > { %p475_p2 = pnand %p473_p0, %p459_p1  ;;  %p481_p4 = scmp.lt.s32.totalorder %s479_s20, %s472_s13 }
  0x25   : > { %p476_p12 = pneg %p475_p2  ;;  %p482_p5 = por %p481_p4, %p480_p11 }
  0x27   : > { %p483_p7 = pnand %p482_p5, %p476_p12 }
  0x29   : > { %486 = shalt.err (!%p483_p7)
}
  0x2a   : > { %s556_s21 = smov 128   ;;  %s557_s22 = smov 8  }
  0x2b   : > { %412 = dma.hbm_to_vmem [thread:$0]  (!%p638_p13), %s634_s25, 4096, %s642_s27, %s644_s29, %s556_s21, %s556_s21, %s557_s22  }
  0x2c   : > { %p395_p9 = scmp.ge.s32.totalorder %s553_s9, 1  ;;  %p106_p1 = scmp.lt.s32.totalorder %s553_s9, 3 }
  0x2e   : > { %p107_p3 = pnand %p395_p9, %p106_p1 }
  0x2f   : > { %s675_s23 = sand.u32 (!%p107_p3), 1, %s545_s7  }
  0x30   : > { %110 = sbr.rel (%p107_p3) target bundleno = 178 (0xb2), region = 24  ;;  %s396_s24 = sshll.u32 (!%p107_p3), %s675_s23, 8 }
  0x31   : > { %s113_s26 = scalar_lea.sflag (!%p107_p3), [#allocation3], %s675_s23  ;;  %s681_s30 = scalar_lea.vmem (!%p107_p3), [#allocation2], %s396_s24 }
  0x37   : > { %532 = dma.done.wait (%p614_p6), %s113_s26, 4096  }
  0x38   : > { %534 = vsyncadd (%p614_p6), %s113_s26, 4294963200  ;;  %v688_v0 = vld [vmem:[%s681_s30] sm:$0xff]  ;;  %v691_v1 = vld [vmem:[%s681_s30 + $0x8] sm:$0xff]  ;;  %s857_s17 = scalar_lea.vmem [#allocation5], %s396_s24  ;;  %s404_s25 = sshll.u32 %s592_s10, 12 }
  0x39   : > { %v694_v2 = vld [vmem:[%s681_s30 + $0x10] sm:$0xff]  ;;  %v697_v3 = vld [vmem:[%s681_s30 + $0x18] sm:$0xff]  ;;  %v167_v4 = vmul.f32 %v688_v0, %v688_v0  ;;  %v168_v5 = vmul.f32 %v691_v1, %v691_v1  ;;  %v706_v7 = vld [vmem:[%s681_s30 + $0x20] sm:$0xff]  ;;  %s316_s27 = sshll.u32 %s857_s17, 4  ;;  %s904_s29 = scalar_lea.hbm %s967_s1, %s404_s25  ;;  %s906_s27 = int_to_ptr.vmem [resolvable:$true] %s316_s27 }
  0x3a   : > { %v169_v6 = vmul.f32 %v694_v2, %v694_v2  ;;  %v170_v8 = vmul.f32 %v697_v3, %v697_v3  ;;  %v711_v10 = vld [vmem:[%s681_s30 + $0x28] sm:$0xff]  ;;  %v171_v11 = vmul.f32 %v706_v7, %v706_v7  ;;  %v716_v13 = vld [vmem:[%s681_s30 + $0x30] sm:$0xff]  ;;  %v721_v16 = vld [vmem:[%s681_s30 + $0x38] sm:$0xff]  ;;  %s303_s2 = scalar_lea.sflag [#allocation4], %s675_s23  ;;  %s487_s3 = scalar_lea.vmem %s906_s27, 4096 }
  0x3b   : > { %v199_v9 = vadd.f32 %v168_v5, %v167_v4  ;;  %v172_v14 = vmul.f32 %v711_v10, %v711_v10  ;;  %v173_v17 = vmul.f32 %v716_v13, %v716_v13  ;;  %v726_v19 = vld [vmem:[%s681_s30 + $0x40] sm:$0xff]  ;;  %v174_v20 = vmul.f32 %v721_v16, %v721_v16  ;;  %v731_v22 = vld [vmem:[%s681_s30 + $0x48] sm:$0xff]  ;;  %v736_v25 = vld [vmem:[%s681_s30 + $0x50] sm:$0xff]  ;;  %p488_p6 = scmp.ne.s32.totalorder %s906_s27, %s487_s3  ;;  %p974_p11 = scmp.ne.s32.totalorder %s971_s18, 0 }
  0x3c   : > { %v175_v23 = vmul.f32 %v726_v19, %v726_v19  ;;  %v176_v26 = vmul.f32 %v731_v22, %v731_v22  ;;  %v741_v28 = vld [vmem:[%s681_s30 + $0x58] sm:$0xff]  ;;  %v177_v29 = vmul.f32 %v736_v25, %v736_v25  ;;  %v746_v31 = vld [vmem:[%s681_s30 + $0x60] sm:$0xff]  ;;  %v751_v34 = vld [vmem:[%s681_s30 + $0x68] sm:$0xff]  ;;  %s558_s4 = smov [#allocation5]  }
  0x3d   : > { %v200_v12 = vadd.f32 %v199_v9, %v169_v6  ;;  %v178_v32 = vmul.f32 %v741_v28, %v741_v28  ;;  %v179_v35 = vmul.f32 %v746_v31, %v746_v31  ;;  %v756_v37 = vld [vmem:[%s681_s30 + $0x70] sm:$0xff]  ;;  %v180_v38 = vmul.f32 %v751_v34, %v751_v34  ;;  %v761_v40 = vld [vmem:[%s681_s30 + $0x78] sm:$0xff]  ;;  %v766_v43 = vld [vmem:[%s681_s30 + $0x80] sm:$0xff]  ;;  %p489_p12 = pnand %p488_p6, %p974_p11  ;;  %s491_s5 = sshll.u32 %s558_s4, 4  ;;  %s492_s5 = int_to_ptr.vmem [resolvable:$false] %s491_s5 }
  0x3e   : > { %v181_v41 = vmul.f32 %v756_v37, %v756_v37  ;;  %v182_v44 = vmul.f32 %v761_v40, %v761_v40  ;;  %v771_v46 = vld [vmem:[%s681_s30 + $0x88] sm:$0xff]  ;;  %v183_v47 = vmul.f32 %v766_v43, %v766_v43  ;;  %v776_v49 = vld [vmem:[%s681_s30 + $0x90] sm:$0xff]  ;;  %v781_v52 = vld [vmem:[%s681_s30 + $0x98] sm:$0xff]  ;;  %s493_s11 = scalar_lea.vmem %s492_s5, 8192  ;;  %p494_p8 = scmp.lt.s32.totalorder %s906_s27, %s492_s5 }
  0x3f   : > { %v201_v15 = vadd.f32 %v200_v12, %v170_v8  ;;  %v184_v50 = vmul.f32 %v771_v46, %v771_v46  ;;  %v185_v53 = vmul.f32 %v776_v49, %v776_v49  ;;  %v786_v55 = vld [vmem:[%s681_s30 + $0xa0] sm:$0xff]  ;;  %v186_v56 = vmul.f32 %v781_v52, %v781_v52  ;;  %v791_v58 = vld [vmem:[%s681_s30 + $0xa8] sm:$0xff]  ;;  %v796_v61 = vld [vmem:[%s681_s30 + $0xb0] sm:$0xff]  ;;  %p490_p13 = pneg %p489_p12  ;;  %p495_p10 = scmp.lt.s32.totalorder %s493_s11, %s487_s3 }
  0x40   : > { %v187_v59 = vmul.f32 %v786_v55, %v786_v55  ;;  %v188_v62 = vmul.f32 %v791_v58, %v791_v58  ;;  %v801_v4 = vld [vmem:[%s681_s30 + $0xb8] sm:$0xff]  ;;  %v189_v5 = vmul.f32 %v796_v61, %v796_v61  ;;  %v806_v8 = vld [vmem:[%s681_s30 + $0xc0] sm:$0xff]  ;;  %v811_v12 = vld [vmem:[%s681_s30 + $0xc8] sm:$0xff] }
  0x41   : > { %v202_v18 = vadd.f32 %v201_v15, %v171_v11  ;;  %v190_v9 = vmul.f32 %v801_v4, %v801_v4  ;;  %p496_p0 = por %p495_p10, %p494_p8 }
  0x43   : > { %v203_v21 = vadd.f32 %v202_v18, %v172_v14  ;;  %v191_v14 = vmul.f32 %v806_v8, %v806_v8  ;;  %v192_v18 = vmul.f32 %v811_v12, %v811_v12  ;;  %p497_p2 = pnand %p496_p0, %p490_p13 }
  0x45   : > { %v204_v24 = vadd.f32 %v203_v21, %v173_v17  ;;  %v816_v17 = vld [vmem:[%s681_s30 + $0xd0] sm:$0xff]  ;;  %v821_v21 = vld [vmem:[%s681_s30 + $0xd8] sm:$0xff] }
  0x47   : > { %v205_v27 = vadd.f32 %v204_v24, %v174_v20 }
  0x49   : > { %v206_v30 = vadd.f32 %v205_v27, %v175_v23  ;;  %v193_v23 = vmul.f32 %v816_v17, %v816_v17  ;;  %v194_v27 = vmul.f32 %v821_v21, %v821_v21 }
  0x4b   : > { %v207_v33 = vadd.f32 %v206_v30, %v176_v26  ;;  %v826_v26 = vld [vmem:[%s681_s30 + $0xe0] sm:$0xff]  ;;  %v831_v30 = vld [vmem:[%s681_s30 + $0xe8] sm:$0xff] }
  0x4d   : > { %v208_v36 = vadd.f32 %v207_v33, %v177_v29 }
  0x4f   : > { %v209_v39 = vadd.f32 %v208_v36, %v178_v32  ;;  %v195_v32 = vmul.f32 %v826_v26, %v826_v26  ;;  %v196_v36 = vmul.f32 %v831_v30, %v831_v30 }
  0x51   : > { %v210_v42 = vadd.f32 %v209_v39, %v179_v35  ;;  %v836_v35 = vld [vmem:[%s681_s30 + $0xf0] sm:$0xff]  ;;  %v841_v39 = vld [vmem:[%s681_s30 + $0xf8] sm:$0xff] }
  0x53   : > { %v211_v45 = vadd.f32 %v210_v42, %v180_v38 }
  0x55   : > { %v212_v48 = vadd.f32 %v211_v45, %v181_v41  ;;  %v197_v41 = vmul.f32 %v836_v35, %v836_v35 }
  0x57   : > { %v213_v51 = vadd.f32 %v212_v48, %v182_v44  ;;  %v198_v44 = vmul.f32 %v841_v39, %v841_v39 }
  0x59   : > { %v214_v54 = vadd.f32 %v213_v51, %v183_v47 }
  0x5b   : > { %v215_v57 = vadd.f32 %v214_v54, %v184_v50 }
  0x5d   : > { %v216_v60 = vadd.f32 %v215_v57, %v185_v53 }
  0x5f   : > { %v217_v63 = vadd.f32 %v216_v60, %v186_v56 }
  0x61   : > { %v218_v6 = vadd.f32 %v217_v63, %v187_v59 }
  0x63   : > { %v219_v11 = vadd.f32 %v218_v6, %v188_v62 }
  0x65   : > { %v220_v15 = vadd.f32 %v219_v11, %v189_v5 }
  0x67   : > { %v221_v20 = vadd.f32 %v220_v15, %v190_v9 }
  0x69   : > { %v222_v24 = vadd.f32 %v221_v20, %v191_v14 }
  0x6b   : > { %v223_v29 = vadd.f32 %v222_v24, %v192_v18 }
  0x6d   : > { %v224_v33 = vadd.f32 %v223_v29, %v193_v23 }
  0x6f   : > { %v225_v38 = vadd.f32 %v224_v33, %v194_v27 }
  0x71   : > { %v226_v42 = vadd.f32 %v225_v38, %v195_v32 }
  0x73   : > { %v227_v45 = vadd.f32 %v226_v42, %v196_v36 }
  0x75   : > { %v228_v47 = vadd.f32 %v227_v45, %v197_v41 }
  0x77   : > { %v229_v48 = vadd.f32 %v228_v47, %v198_v44 }
  0x79   : > { %v230_v50 = vrot.slane %v229_v48, 4 }
  0x7b   : > { %v231_v51 = vadd.f32 %v230_v50, %v229_v48 }
  0x7d   : > { %v232_v53 = vrot.slane %v231_v51, 2 }
  0x7f   : > { %v233_v54 = vadd.f32 %v232_v53, %v231_v51 }
  0x81   : > { %v234_v56 = vrot.slane %v233_v54, 1 }
  0x83   : > { %v235_v57 = vadd.f32 %v234_v56, %v233_v54 }
  0x85   : > { %v236_v59 = vmax.f32 %v235_v57, 1e-24 }
  0x87   : > { %455 = vrsqrt.f32 %v236_v59 }
  0x91   : > { %v456_v60 = vpop.eup %455 }
  0x92   : > { %v238_v62 = vmul.f32 %v456_v60, %v688_v0  ;;  %v239_v63 = vmul.f32 %v456_v60, %v691_v1  ;;  %v240_v5 = vmul.f32 %v456_v60, %v694_v2  ;;  %v241_v6 = vmul.f32 %v456_v60, %v697_v3 }
  0x93   : > { %v242_v9 = vmul.f32 %v456_v60, %v706_v7  ;;  %v243_v11 = vmul.f32 %v456_v60, %v711_v10  ;;  %v244_v14 = vmul.f32 %v456_v60, %v716_v13  ;;  %v245_v15 = vmul.f32 %v456_v60, %v721_v16 }
  0x94   : > { %270 = vst [vmem:[%s857_s17] sm:$0xff] %v238_v62  ;;  %271 = vst [vmem:[%s857_s17 + $0x8] sm:$0xff] %v239_v63  ;;  %v246_v0 = vmul.f32 %v456_v60, %v726_v19  ;;  %v247_v1 = vmul.f32 %v456_v60, %v731_v22  ;;  %v248_v2 = vmul.f32 %v456_v60, %v736_v25 }
  0x95   : > { %272 = vst [vmem:[%s857_s17 + $0x10] sm:$0xff] %v240_v5  ;;  %273 = vst [vmem:[%s857_s17 + $0x18] sm:$0xff] %v241_v6  ;;  %v249_v3 = vmul.f32 %v456_v60, %v741_v28  ;;  %v250_v7 = vmul.f32 %v456_v60, %v746_v31  ;;  %v251_v10 = vmul.f32 %v456_v60, %v751_v34 }
  0x96   : > { %274 = vst [vmem:[%s857_s17 + $0x20] sm:$0xff] %v242_v9  ;;  %275 = vst [vmem:[%s857_s17 + $0x28] sm:$0xff] %v243_v11  ;;  %v252_v13 = vmul.f32 %v456_v60, %v756_v37  ;;  %v253_v16 = vmul.f32 %v456_v60, %v761_v40  ;;  %v254_v19 = vmul.f32 %v456_v60, %v766_v43 }
  0x97   : > { %276 = vst [vmem:[%s857_s17 + $0x30] sm:$0xff] %v244_v14  ;;  %277 = vst [vmem:[%s857_s17 + $0x38] sm:$0xff] %v245_v15  ;;  %v255_v22 = vmul.f32 %v456_v60, %v771_v46  ;;  %v256_v25 = vmul.f32 %v456_v60, %v776_v49  ;;  %v257_v28 = vmul.f32 %v456_v60, %v781_v52 }
  0x98   : > { %278 = vst [vmem:[%s857_s17 + $0x40] sm:$0xff] %v246_v0  ;;  %279 = vst [vmem:[%s857_s17 + $0x48] sm:$0xff] %v247_v1  ;;  %v258_v31 = vmul.f32 %v456_v60, %v786_v55  ;;  %v259_v34 = vmul.f32 %v456_v60, %v791_v58  ;;  %v260_v37 = vmul.f32 %v456_v60, %v796_v61 }
  0x99   : > { %280 = vst [vmem:[%s857_s17 + $0x50] sm:$0xff] %v248_v2  ;;  %281 = vst [vmem:[%s857_s17 + $0x58] sm:$0xff] %v249_v3  ;;  %v261_v40 = vmul.f32 %v456_v60, %v801_v4  ;;  %v262_v43 = vmul.f32 %v456_v60, %v806_v8  ;;  %v263_v46 = vmul.f32 %v456_v60, %v811_v12 }
  0x9a   : > { %282 = vst [vmem:[%s857_s17 + $0x60] sm:$0xff] %v250_v7  ;;  %283 = vst [vmem:[%s857_s17 + $0x68] sm:$0xff] %v251_v10  ;;  %v264_v49 = vmul.f32 %v456_v60, %v816_v17  ;;  %v265_v52 = vmul.f32 %v456_v60, %v821_v21  ;;  %v266_v55 = vmul.f32 %v456_v60, %v826_v26 }
  0x9b   : > { %284 = vst [vmem:[%s857_s17 + $0x70] sm:$0xff] %v252_v13  ;;  %285 = vst [vmem:[%s857_s17 + $0x78] sm:$0xff] %v253_v16  ;;  %v267_v58 = vmul.f32 %v456_v60, %v831_v30  ;;  %v268_v61 = vmul.f32 %v456_v60, %v836_v35  ;;  %v269_v4 = vmul.f32 %v456_v60, %v841_v39 }
  0x9c   : > { %286 = vst [vmem:[%s857_s17 + $0x80] sm:$0xff] %v254_v19  ;;  %287 = vst [vmem:[%s857_s17 + $0x88] sm:$0xff] %v255_v22 }
  0x9d   : > { %288 = vst [vmem:[%s857_s17 + $0x90] sm:$0xff] %v256_v25  ;;  %289 = vst [vmem:[%s857_s17 + $0x98] sm:$0xff] %v257_v28 }
  0x9e   : > { %290 = vst [vmem:[%s857_s17 + $0xa0] sm:$0xff] %v258_v31  ;;  %291 = vst [vmem:[%s857_s17 + $0xa8] sm:$0xff] %v259_v34 }
  0x9f   : > { %292 = vst [vmem:[%s857_s17 + $0xb0] sm:$0xff] %v260_v37  ;;  %293 = vst [vmem:[%s857_s17 + $0xb8] sm:$0xff] %v261_v40 }
  0xa0   : > { %294 = vst [vmem:[%s857_s17 + $0xc0] sm:$0xff] %v262_v43  ;;  %295 = vst [vmem:[%s857_s17 + $0xc8] sm:$0xff] %v263_v46 }
  0xa1   : > { %296 = vst [vmem:[%s857_s17 + $0xd0] sm:$0xff] %v264_v49  ;;  %297 = vst [vmem:[%s857_s17 + $0xd8] sm:$0xff] %v265_v52 }
  0xa2   : > { %298 = vst [vmem:[%s857_s17 + $0xe0] sm:$0xff] %v266_v55  ;;  %299 = vst [vmem:[%s857_s17 + $0xe8] sm:$0xff] %v267_v58 }
  0xa3   : > { %300 = vst [vmem:[%s857_s17 + $0xf0] sm:$0xff] %v268_v61  ;;  %301 = vst [vmem:[%s857_s17 + $0xf8] sm:$0xff] %v269_v4 }
  0xa4   : > { %500 = shalt.err (!%p497_p2)
}
  0xa5   : > { %s501_s13 = scalar_lea.hbm %s904_s29, 4096  ;;  %s505_s20 = scalar_lea.hbm %s967_s1, 8192 }
  0xa6   : > { %p502_p4 = scmp.ne.s32.totalorder %s904_s29, %s501_s13  ;;  %p506_p9 = scmp.lt.u32.totalorder %s904_s29, %s967_s1 }
  0xa7   : > { %p507_p1 = scmp.lt.u32.totalorder %s505_s20, %s501_s13  ;;  %p509_p6 = scmp.lt.u32.totalorder %s501_s13, %s904_s29 }
  0xa8   : > { %p503_p5 = pnand %p502_p4, %p974_p11 }
  0xa9   : > { %p508_p3 = por %p507_p1, %p506_p9 }
  0xaa   : > { %p504_p7 = pneg %p503_p5 }
  0xab   : > { %p510_p12 = por %p509_p6, %p508_p3 }
  0xad   : > { %p511_p13 = pnand %p510_p12, %p504_p7 }
  0xaf   : > { %514 = shalt.err (!%p511_p13)
}
  0xb0   : > { %s559_s24 = smov 128   ;;  %s560_s26 = smov 8  }
  0xb1   : > { %407 = dma.vmem_to_hbm [thread:$0]  (%p974_p11), %s906_s27, 4096, %s904_s29, %s303_s2, %s559_s24, %s559_s24, %s560_s26  }
  0xb2 PF: > { %s331_s30 = sand.u32 1, %s541_s6   ;;  %p975_p8 = scmp.ne.s32.totalorder %s972_s19, 0 }
  0xb3   : > { %p976_p10 = scmp.ge.s32.totalorder %s553_s9, 2  ;;  %s332_s17 = scalar_lea.sflag [#allocation4], %s331_s30 }
  0xb5   : > { %p414_p0 = pnand %p976_p10, %p975_p8 }
  0xb7   : > { %536 = dma.done.wait (!%p414_p0), %s332_s17, 4096  }
  0xb8   : > { %538 = vsyncadd (!%p414_p0), %s332_s17, 4294963200  ;;  %p14_p2 = scmp.ge.s32.totalorder %s596_s12, 4   ;;  %s977_s6 = smov %s545_s7 }
  0xb9   : > { %s978_s7 = smov %s549_s8  ;;  %s979_s8 = smov %s608_s15 }
  0xba   : > { %s980_s9 = smov %s596_s12  ;;  %16 = sbr.rel (!%p14_p2) target bundleno = 5 (0x5), region = 69 }
  0xc1   :  { %337 = vsyncpa [#allocation3], 1 }
  0xc2   :  { %339 = vsyncpa [#allocation3 + $0x1], 1 }
  0xc3   :  { %340 = vsyncpa [#allocation4], 1 }
  0xc4   :  { %342 = vsyncpa [#allocation4 + $0x1], 1 }

</bundles_post_ra>
